<compile_context>
chip_gen: v7x
topology: tpu7x:2x2x1
jax: 0.10.0
libtpu: 0.0.40
codegen_flags: <defaults>
</compile_context>

<pallas_src>
import functools

import jax
import jax.numpy as jnp
from jax.experimental import pallas as pl
from jax.experimental.pallas import tpu as pltpu

# ----------------------------- model sizes ---------------------------------
B, C, H, W = 2, 4, 16, 16          # input (NCHW)
HWSP = H * W                       # flattened spatial size (256, lane axis)
FEAT = 32                          # backbone feature channels (= projector dim)
HIDDEN = 64                        # projector hidden size
PROJ = 32                          # projection_size
EPS = 1e-5                         # BatchNorm1d eps

# ------------------------ packed parameter slab layout -----------------------
# One (ROWS, 128) f32 slab; every region starts on an 8-row boundary.
#   rows [R_WC , R_WC+FEAT)  lanes [0, C)      : conv weight, transposed (FEAT, C)
#   rows [R_WC , R_WC+FEAT)  lane  C           : conv bias (FEAT,)
#   rows [R_W1 , R_W1+FEAT)  lanes [0, HIDDEN) : projector Linear-1 weight (FEAT, HIDDEN)
#   rows [R_BN , R_BN+3)     lanes [0, HIDDEN) : [linear-1 bias, BN gamma, BN beta]
#   rows [R_W2 , R_W2+HIDDEN) lanes [0, PROJ)  : projector Linear-2 weight (lanes >=PROJ are 0)
#   row   R_B2               lanes [0, PROJ)   : projector Linear-2 bias    (lanes >=PROJ are 0)
R_WC = 0
R_W1 = 32
R_BN = 64
R_W2 = 72
R_B2 = 136
ROWS = 144
LANES = 128

OUT_ROWS = ((B + 7) // 8) * 8      # 8  : lane-dense, unmasked output store
OUT_LANES = LANES                  # 128


# --------------------------- fused Pallas kernel ----------------------------
def byol_fused_kernel(x_ref, p_ref, o_ref):
    """Backbone body (1x1 conv -> ReLU -> global avg pool) + BYOL projector.

    x_ref: (B, C, HW)          input, free reshape of NCHW (HW on lanes)
    p_ref: (ROWS, 128)         packed parameter slab (layout above)
    o_ref: (OUT_ROWS, 128)     padded output; rows [0,B), lanes [0,PROJ) valid
    """
    x = x_ref[...]                                        # (B, C, HW)

    # Static slices of the packed slab (all 8-aligned row starts).
    wcbc = p_ref[R_WC:R_WC + FEAT, 0:C + 1]               # (FEAT, C+1): wc^T | bc
    w1 = p_ref[R_W1:R_W1 + FEAT, 0:HIDDEN]                # (FEAT, HIDDEN)
    bn = p_ref[R_BN:R_BN + 3, 0:HIDDEN]                   # (3, HIDDEN): b1, gamma, beta
    w2 = p_ref[R_W2:R_W2 + HIDDEN, :]                     # (HIDDEN, 128), lanes>=PROJ are 0
    b2 = p_ref[R_B2:R_B2 + 1, :]                          # (1, 128),      lanes>=PROJ are 0

    # --- backbone up to the hooked layer -----------------------------------
    # 1x1 conv over channels as C=4 unrolled VPU FMAs in a (B, FEAT, HW)
    # layout: x rows are lane-dense, broadcast across FEAT sublanes; the weight
    # columns are tiny per-sublane scalars broadcast across lanes.
    h = x[:, 0:1, :] * wcbc[None, :, 0:1]                 # (B, FEAT, HW)
    for c in range(1, C):
        h = h + x[:, c:c + 1, :] * wcbc[None, :, c:c + 1]
    h = h + wcbc[None, :, C:C + 1]                        # conv bias
    h = jnp.maximum(h, 0.0)                               # ReLU

    # Global average pool over the lane axis -> (B, FEAT); the forward hook's
    # flatten(start_dim=1) of the (B, FEAT, 1, 1) pool output is exactly this.
    feats = jnp.mean(h, axis=-1)

    # --- BYOL projector: Linear -> BatchNorm1d (train mode) -> ReLU -> Linear
    z = jnp.dot(feats, w1, preferred_element_type=jnp.float32) + bn[0:1, :]
    mean = jnp.mean(z, axis=0, keepdims=True)             # batch mean
    var = jnp.mean((z - mean) ** 2, axis=0, keepdims=True)  # biased batch var
    zn = (z - mean) * jax.lax.rsqrt(var + EPS)
    zn = zn * bn[1:2, :] + bn[2:3, :]                     # gamma, beta
    zr = jnp.maximum(zn, 0.0)

    # Pad the M dimension to 8 rows so the final matmul + store are lane/
    # sublane-dense and unmasked (padding rows/lanes are sliced off outside).
    zr_pad = jnp.concatenate(
        [zr, jnp.zeros((OUT_ROWS - B, HIDDEN), jnp.float32)], axis=0)
    o_ref[...] = jnp.dot(zr_pad, w2, preferred_element_type=jnp.float32) + b2
    # TODO(synk): BatchNorm1d running_mean/running_var buffer updates (train-
    # mode side effect) are not emitted; forward output is unaffected.


# ------------------------------ wrapper --------------------------------------
@jax.jit
def encoder_wrapper_forward(x_nchw, param_slab):
    """Equivalent of EncoderWrapper.forward(x): backbone -> hook -> projector.

    No transpose: NCHW -> (B, C, H*W) is a free reshape, and the kernel keeps
    the spatial axis on lanes. The classifier-head output is discarded by the
    original module, so it is never computed.
    """
    b, c, h, w = x_nchw.shape
    x_flat = x_nchw.reshape(b, c, h * w)                  # free reshape

    out_pad = pl.pallas_call(
        byol_fused_kernel,
        out_shape=jax.ShapeDtypeStruct((OUT_ROWS, OUT_LANES), jnp.float32),
        in_specs=[
            pl.BlockSpec(memory_space=pltpu.MemorySpace.VMEM),
            pl.BlockSpec(memory_space=pltpu.MemorySpace.VMEM),
        ],
        out_specs=pl.BlockSpec(memory_space=pltpu.MemorySpace.VMEM),
    )(x_flat, param_slab)
    return out_pad[:b, :PROJ]


def init_params(key):
    """Build the packed (ROWS, 128) parameter slab."""
    ks = jax.random.split(key, 7)
    scale = 0.05
    wc = scale * jax.random.normal(ks[0], (C, FEAT), jnp.float32)      # 1x1 conv
    bc = scale * jax.random.normal(ks[1], (FEAT,), jnp.float32)
    w1 = scale * jax.random.normal(ks[2], (FEAT, HIDDEN), jnp.float32)  # Linear 1
    b1 = scale * jax.random.normal(ks[3], (HIDDEN,), jnp.float32)
    gamma = jnp.ones((HIDDEN,), jnp.float32)                            # BN weight
    beta = jnp.zeros((HIDDEN,), jnp.float32)                            # BN bias
    w2 = scale * jax.random.normal(ks[4], (HIDDEN, PROJ), jnp.float32)  # Linear 2
    b2 = scale * jax.random.normal(ks[5], (PROJ,), jnp.float32)

    slab = jnp.zeros((ROWS, LANES), jnp.float32)
    slab = slab.at[R_WC:R_WC + FEAT, 0:C].set(wc.T)       # (FEAT, C)
    slab = slab.at[R_WC:R_WC + FEAT, C].set(bc)
    slab = slab.at[R_W1:R_W1 + FEAT, 0:HIDDEN].set(w1)
    slab = slab.at[R_BN + 0, 0:HIDDEN].set(b1)
    slab = slab.at[R_BN + 1, 0:HIDDEN].set(gamma)
    slab = slab.at[R_BN + 2, 0:HIDDEN].set(beta)
    slab = slab.at[R_W2:R_W2 + HIDDEN, 0:PROJ].set(w2)
    slab = slab.at[R_B2, 0:PROJ].set(b2)
    return slab


if __name__ == "__main__":
    key = jax.random.PRNGKey(0)
    kx, kp = jax.random.split(key)
    x = jax.random.normal(kx, (B, C, H, W), jnp.float32)   # NCHW input
    param_slab = init_params(kp)

    out = encoder_wrapper_forward(x, param_slab)
    out = jax.block_until_ready(out)
    assert out.shape == (B, PROJ), out.shape
    assert bool(jnp.all(jnp.isfinite(out)))
    print("KERNEL_OK")
</pallas_src>

<mosaic_0001>
module attributes {stable_mosaic.version = 11 : i64} {
  func.func @byol_fused_kernel(%arg0: memref<2x4x256xf32, #tpu.memory_space<vmem>>, %arg1: memref<144x128xf32, #tpu.memory_space<vmem>>, %arg2: memref<8x128xf32, #tpu.memory_space<vmem>>) attributes {dimension_semantics = [], scalar_prefetch = 0 : i64, scratch_operands = 0 : i64, tpu.core_type = #tpu.core_type<tc>} {
    %c0 = arith.constant 0 : index
    %c0_0 = arith.constant 0 : index
    %c0_1 = arith.constant 0 : index
    %0 = vector.load %arg0[%c0, %c0_0, %c0_1] : memref<2x4x256xf32, #tpu.memory_space<vmem>>, vector<2x4x256xf32>
    %c0_2 = arith.constant 0 : index
    %c0_3 = arith.constant 0 : index
    %1 = vector.load %arg1[%c0_2, %c0_3] : memref<144x128xf32, #tpu.memory_space<vmem>>, vector<32x5xf32>
    %c32 = arith.constant 32 : index
    %c0_4 = arith.constant 0 : index
    %2 = vector.load %arg1[%c32, %c0_4] : memref<144x128xf32, #tpu.memory_space<vmem>>, vector<32x64xf32>
    %c64 = arith.constant 64 : index
    %c0_5 = arith.constant 0 : index
    %3 = vector.load %arg1[%c64, %c0_5] : memref<144x128xf32, #tpu.memory_space<vmem>>, vector<3x64xf32>
    %c72 = arith.constant 72 : index
    %c0_6 = arith.constant 0 : index
    %4 = vector.load %arg1[%c72, %c0_6] : memref<144x128xf32, #tpu.memory_space<vmem>>, vector<64x128xf32>
    %c136 = arith.constant 136 : index
    %c0_7 = arith.constant 0 : index
    %5 = vector.load %arg1[%c136, %c0_7] : memref<144x128xf32, #tpu.memory_space<vmem>>, vector<1x128xf32>
    %6 = vector.extract_strided_slice %0 {offsets = [0, 0, 0], sizes = [2, 1, 256], strides = [1, 1, 1]} : vector<2x4x256xf32> to vector<2x1x256xf32>
    %7 = vector.extract_strided_slice %1 {offsets = [0, 0], sizes = [32, 1], strides = [1, 1]} : vector<32x5xf32> to vector<32x1xf32>
    %8 = vector.shape_cast %7 : vector<32x1xf32> to vector<1x32x1xf32>
    %9 = vector.broadcast %6 : vector<2x1x256xf32> to vector<2x32x256xf32>
    %10 = vector.broadcast %8 : vector<1x32x1xf32> to vector<2x32x256xf32>
    %11 = arith.mulf %9, %10 : vector<2x32x256xf32>
    %12 = vector.extract_strided_slice %0 {offsets = [0, 1, 0], sizes = [2, 1, 256], strides = [1, 1, 1]} : vector<2x4x256xf32> to vector<2x1x256xf32>
    %13 = vector.extract_strided_slice %1 {offsets = [0, 1], sizes = [32, 1], strides = [1, 1]} : vector<32x5xf32> to vector<32x1xf32>
    %14 = vector.shape_cast %13 : vector<32x1xf32> to vector<1x32x1xf32>
    %15 = vector.broadcast %12 : vector<2x1x256xf32> to vector<2x32x256xf32>
    %16 = vector.broadcast %14 : vector<1x32x1xf32> to vector<2x32x256xf32>
    %17 = arith.mulf %15, %16 : vector<2x32x256xf32>
    %18 = arith.addf %11, %17 : vector<2x32x256xf32>
    %19 = vector.extract_strided_slice %0 {offsets = [0, 2, 0], sizes = [2, 1, 256], strides = [1, 1, 1]} : vector<2x4x256xf32> to vector<2x1x256xf32>
    %20 = vector.extract_strided_slice %1 {offsets = [0, 2], sizes = [32, 1], strides = [1, 1]} : vector<32x5xf32> to vector<32x1xf32>
    %21 = vector.shape_cast %20 : vector<32x1xf32> to vector<1x32x1xf32>
    %22 = vector.broadcast %19 : vector<2x1x256xf32> to vector<2x32x256xf32>
    %23 = vector.broadcast %21 : vector<1x32x1xf32> to vector<2x32x256xf32>
    %24 = arith.mulf %22, %23 : vector<2x32x256xf32>
    %25 = arith.addf %18, %24 : vector<2x32x256xf32>
    %26 = vector.extract_strided_slice %0 {offsets = [0, 3, 0], sizes = [2, 1, 256], strides = [1, 1, 1]} : vector<2x4x256xf32> to vector<2x1x256xf32>
    %27 = vector.extract_strided_slice %1 {offsets = [0, 3], sizes = [32, 1], strides = [1, 1]} : vector<32x5xf32> to vector<32x1xf32>
    %28 = vector.shape_cast %27 : vector<32x1xf32> to vector<1x32x1xf32>
    %29 = vector.broadcast %26 : vector<2x1x256xf32> to vector<2x32x256xf32>
    %30 = vector.broadcast %28 : vector<1x32x1xf32> to vector<2x32x256xf32>
    %31 = arith.mulf %29, %30 : vector<2x32x256xf32>
    %32 = arith.addf %25, %31 : vector<2x32x256xf32>
    %33 = vector.extract_strided_slice %1 {offsets = [0, 4], sizes = [32, 1], strides = [1, 1]} : vector<32x5xf32> to vector<32x1xf32>
    %34 = vector.shape_cast %33 : vector<32x1xf32> to vector<1x32x1xf32>
    %35 = vector.broadcast %34 : vector<1x32x1xf32> to vector<2x32x256xf32>
    %36 = arith.addf %32, %35 : vector<2x32x256xf32>
    %cst = arith.constant 0.000000e+00 : f32
    %37 = vector.broadcast %cst : f32 to vector<2x32x256xf32>
    %38 = arith.maximumf %36, %37 : vector<2x32x256xf32>
    %cst_8 = arith.constant dense<0.000000e+00> : vector<2x32xf32>
    %39 = vector.multi_reduction <add>, %38, %cst_8 [2] : vector<2x32x256xf32> to vector<2x32xf32>
    %cst_9 = arith.constant 2.560000e+02 : f32
    %40 = vector.broadcast %cst_9 : f32 to vector<2x32xf32>
    %41 = arith.divf %39, %40 : vector<2x32xf32>
    %cst_10 = arith.constant dense<0.000000e+00> : vector<2x64xf32>
    %42 = tpu.matmul %41, %2, %cst_10 {dimension_numbers = #tpu.dot_dimension_numbers<[1], [0], [0], [1], [0, 0, 1, 1], [], []>} : vector<2x32xf32>, vector<32x64xf32>, vector<2x64xf32> -> vector<2x64xf32>
    %43 = vector.extract_strided_slice %3 {offsets = [0, 0], sizes = [1, 64], strides = [1, 1]} : vector<3x64xf32> to vector<1x64xf32>
    %44 = vector.broadcast %43 : vector<1x64xf32> to vector<2x64xf32>
    %45 = arith.addf %42, %44 : vector<2x64xf32>
    %cst_11 = arith.constant dense<0.000000e+00> : vector<64xf32>
    %46 = vector.multi_reduction <add>, %45, %cst_11 [0] : vector<2x64xf32> to vector<64xf32>
    %47 = vector.shape_cast %46 : vector<64xf32> to vector<1x64xf32>
    %cst_12 = arith.constant 2.000000e+00 : f32
    %48 = vector.broadcast %cst_12 : f32 to vector<1x64xf32>
    %49 = arith.divf %47, %48 : vector<1x64xf32>
    %50 = vector.broadcast %49 : vector<1x64xf32> to vector<2x64xf32>
    %51 = arith.subf %45, %50 : vector<2x64xf32>
    %52 = arith.mulf %51, %51 : vector<2x64xf32>
    %cst_13 = arith.constant dense<0.000000e+00> : vector<64xf32>
    %53 = vector.multi_reduction <add>, %52, %cst_13 [0] : vector<2x64xf32> to vector<64xf32>
    %54 = vector.shape_cast %53 : vector<64xf32> to vector<1x64xf32>
    %cst_14 = arith.constant 2.000000e+00 : f32
    %55 = vector.broadcast %cst_14 : f32 to vector<1x64xf32>
    %56 = arith.divf %54, %55 : vector<1x64xf32>
    %57 = vector.broadcast %49 : vector<1x64xf32> to vector<2x64xf32>
    %58 = arith.subf %45, %57 : vector<2x64xf32>
    %cst_15 = arith.constant 9.99999974E-6 : f32
    %59 = vector.broadcast %cst_15 : f32 to vector<1x64xf32>
    %60 = arith.addf %56, %59 : vector<1x64xf32>
    %61 = math.rsqrt %60 : vector<1x64xf32>
    %62 = vector.broadcast %61 : vector<1x64xf32> to vector<2x64xf32>
    %63 = arith.mulf %58, %62 : vector<2x64xf32>
    %64 = vector.extract_strided_slice %3 {offsets = [1, 0], sizes = [1, 64], strides = [1, 1]} : vector<3x64xf32> to vector<1x64xf32>
    %65 = vector.broadcast %64 : vector<1x64xf32> to vector<2x64xf32>
    %66 = arith.mulf %63, %65 : vector<2x64xf32>
    %67 = vector.extract_strided_slice %3 {offsets = [2, 0], sizes = [1, 64], strides = [1, 1]} : vector<3x64xf32> to vector<1x64xf32>
    %68 = vector.broadcast %67 : vector<1x64xf32> to vector<2x64xf32>
    %69 = arith.addf %66, %68 : vector<2x64xf32>
    %cst_16 = arith.constant 0.000000e+00 : f32
    %70 = vector.broadcast %cst_16 : f32 to vector<2x64xf32>
    %71 = arith.maximumf %69, %70 : vector<2x64xf32>
    %cst_17 = arith.constant 0.000000e+00 : f32
    %72 = vector.broadcast %cst_17 : f32 to vector<6x64xf32>
    %73 = tpu.concatenate %71, %72 in 0 : vector<2x64xf32>, vector<6x64xf32> -> vector<8x64xf32>
    %cst_18 = arith.constant dense<0.000000e+00> : vector<8x128xf32>
    %74 = tpu.matmul %73, %4, %cst_18 {dimension_numbers = #tpu.dot_dimension_numbers<[1], [0], [0], [1], [0, 0, 1, 1], [], []>} : vector<8x64xf32>, vector<64x128xf32>, vector<8x128xf32> -> vector<8x128xf32>
    %75 = vector.broadcast %5 : vector<1x128xf32> to vector<8x128xf32>
    %76 = arith.addf %74, %75 : vector<8x128xf32>
    %c0_19 = arith.constant 0 : index
    %c0_20 = arith.constant 0 : index
    %77 = vector.load %arg2[%c0_19, %c0_20] : memref<8x128xf32, #tpu.memory_space<vmem>>, vector<8x128xf32>
    tpu.vector_store %arg2[%c0_19, %c0_20], %76 {strides = array<i32>} : memref<8x128xf32, #tpu.memory_space<vmem>>, vector<8x128xf32>,
    return
  }
}

</mosaic_0001>

<bundles_post_ra>
// kernel: encoder_wrapper_forward.1
= control target key start
LH: loop header
LB: loop body
LE: loop exit
PB: predicated region body
PF: predicated region fallthrough
CT: control target
= control target key end

     0   :  { %v773_v0 = vmov 1   ;;  %v774_v1 = vmov 0   ;;  %v775_v6 = vmov 2   ;;  %v776_v7 = vmov 3   ;;  %s968_s1 = inlined_call_operand.vmem [shape: f32[144,128], index: 1, kind: input, shape index: {}]   ;;  %s969_s0 = inlined_call_operand.vmem [shape: f32[2,4,256], index: 0, kind: input, shape index: {}]   ;;  %s970_s2 = inlined_call_operand.vmem [shape: f32[8,128], index: 2, kind: output, shape index: {}]  }
   0x1   :  { %764 = vset.pattern.permute.xlu1 %v773_v0  ;;  %763 = vset.pattern.permute.xlu0 %v774_v1  ;;  %v13_v2 = vld [vmem:[%s968_s1] sm:$0xff]  ;;  %v14_v3 = vld [vmem:[%s968_s1 + $0x8] sm:$0xff]  ;;  %v15_v4 = vld [vmem:[%s968_s1 + $0x10] sm:$0xff]  ;;  %v777_v8 = vmov 4   ;;  %v33_v9 = vlaneseq  ;;  %vm779_vm0 = vmmov 0   ;;  %vm461_vm1 = vcmask 130112  }
   0x2   :  { %142 = vperm.xlu1 %764, %v13_v2   ;;  %71 = vperm.xlu0 %763, %v13_v2   ;;  %v16_v5 = vld [vmem:[%s968_s1 + $0x18] sm:$0xff]  ;;  %v11_v14 = vld [vmem:[%s969_s0] sm:$0xff]  ;;  %v12_v15 = vld [vmem:[%s969_s0 + $0x8] sm:$0xff]  ;;  %vm468_vm2 = vcmask 195712   ;;  %vm475_vm3 = vcmask 261312   ;;  %vm496_vm4 = vcmask 1041409  }
   0x3   :  { %v809_v10 = vshrl.u32 %v33_v9, 7  ;;  %vm498_vm5 = vcmask 261120   ;;  %vm571_vm6 = vcmask 517120   ;;  %vm605_vm7 = vcmask 1041408  }
   0x4   :  { %vm611_vm8 = vcmask 523264  }
   0x5   :  { %v812_v11 = vsub.s32 1, %v809_v10  ;;  %v111_v12 = vsub.s32 5, %v809_v10  ;;  %v816_v13 = vsub.s32 0, %v809_v10  ;;  %v39_v16 = vsub.s32 4, %v809_v10 }
   0x6   :  { %146 = vperm.xlu1 %764, %v14_v3   ;;  %76 = vperm.xlu0 %763, %v14_v3   ;;  %v830_v27 = vsub.s32 2, %v809_v10  ;;  %v195_v28 = vsub.s32 6, %v809_v10  ;;  %v275_v31 = vsub.s32 3, %v809_v10  ;;  %v279_v32 = vsub.s32 7, %v809_v10 }
   0x7   :  { %v108_v19 = vrot.slane %v11_v14, %v812_v11  ;;  %v112_v20 = vrot.slane %v11_v14, %v111_v12  ;;  %v116_v21 = vrot.slane %v12_v15, %v812_v11  ;;  %v36_v22 = vrot.slane %v11_v14, %v816_v13 }
   0x8   :  { %v120_v23 = vrot.slane %v12_v15, %v111_v12  ;;  %v40_v24 = vrot.slane %v11_v14, %v39_v16  ;;  %v44_v25 = vrot.slane %v12_v15, %v816_v13  ;;  %v48_v26 = vrot.slane %v12_v15, %v39_v16 }
   0x9   :  { %v128_v33 = vrot.slane %v108_v19, %v812_v11  ;;  %v132_v34 = vrot.slane %v112_v20, %v812_v11  ;;  %v136_v35 = vrot.slane %v116_v21, %v812_v11  ;;  %v56_v36 = vrot.slane %v36_v22, %v816_v13 }
   0xa   :  { %150 = vperm.xlu1 %764, %v15_v4   ;;  %81 = vperm.xlu0 %763, %v15_v4   ;;  %v840_v37 = vrot.slane %v120_v23, %v812_v11  ;;  %v60_v38 = vrot.slane %v40_v24, %v816_v13  ;;  %v64_v39 = vrot.slane %v44_v25, %v816_v13 }
   0xb   :  { %v68_v40 = vrot.slane %v48_v26, %v816_v13  ;;  %v192_v41 = vrot.slane %v11_v14, %v830_v27  ;;  %v196_v42 = vrot.slane %v11_v14, %v195_v28  ;;  %v200_v43 = vrot.slane %v12_v15, %v830_v27 }
   0xc   :  { %v204_v44 = vrot.slane %v12_v15, %v195_v28  ;;  %v276_v47 = vrot.slane %v11_v14, %v275_v31  ;;  %v280_v48 = vrot.slane %v11_v14, %v279_v32  ;;  %v284_v49 = vrot.slane %v12_v15, %v275_v31 }
   0xd   :  { %v288_v50 = vrot.slane %v12_v15, %v279_v32  ;;  %v849_v59 = vrot.slane %v192_v41, %v830_v27  ;;  %v852_v60 = vrot.slane %v196_v42, %v830_v27  ;;  %v855_v61 = vrot.slane %v200_v43, %v830_v27 }
   0xe   :  { %154 = vperm.xlu1 %764, %v16_v5   ;;  %86 = vperm.xlu0 %763, %v16_v5  }
  0x12   :  { %766 = vset.pattern.permute.xlu1 %v775_v6  ;;  %765 = vset.pattern.permute.xlu0 %v775_v6  ;;  %v864_v6 = vrot.slane %v284_v49, %v275_v31 }
  0x13   :  { %230 = vperm.xlu1 %766, %v14_v3   ;;  %226 = vperm.xlu0 %765, %v13_v2  }
  0x17   :  { %234 = vperm.xlu1 %766, %v15_v4   ;;  %238 = vperm.xlu0 %765, %v16_v5  }
  0x1b   :  { %767 = vset.pattern.permute.xlu1 %v776_v7  ;;  %768 = vset.pattern.permute.xlu0 %v776_v7  ;;  %v866_v7 = vrot.slane %v288_v50, %v275_v31 }
  0x1c   :  { %310 = vperm.xlu1 %767, %v13_v2   ;;  %314 = vperm.xlu0 %768, %v14_v3  }
  0x20   :  { %318 = vperm.xlu1 %767, %v15_v4   ;;  %769 = vset.pattern.permute.xlu0 %v777_v8 }
  0x21   :  { %358 = vperm.xlu0 %769, %v13_v2   ;;  %v858_v2 = vrot.slane %v204_v44, %v830_v27 }
  0x24   :  { %322 = vperm.xlu1 %767, %v16_v5  }
  0x25   :  { %370 = vperm.xlu0 %769, %v16_v5   ;;  %v862_v5 = vrot.slane %v280_v48, %v275_v31 }
  0x28   :  { %770 = vset.pattern.permute.xlu1 %v777_v8 }
  0x29   :  { %362 = vperm.xlu1 %770, %v14_v3   ;;  %v860_v3 = vrot.slane %v276_v47, %v275_v31 }
  0x2d   :  { %366 = vperm.xlu1 %770, %v15_v4  }
  0x81   :  { %v143_v17 = vpop.permute.xlu1 %142  ;;  %v72_v18 = vpop.permute.xlu0 %71 }
  0x82   :  { %v157_v51 = vmul.f32 %v143_v17, %v128_v33  ;;  %v158_v52 = vmul.f32 %v143_v17, %v132_v34  ;;  %v165_v53 = vmul.f32 %v143_v17, %v136_v35  ;;  %v89_v54 = vmul.f32 %v72_v18, %v56_v36 }
  0x83   :  { %v166_v55 = vmul.f32 %v143_v17, %v840_v37  ;;  %v90_v56 = vmul.f32 %v72_v18, %v60_v38  ;;  %v97_v57 = vmul.f32 %v72_v18, %v64_v39  ;;  %v98_v58 = vmul.f32 %v72_v18, %v68_v40 }
  0x84   :  { %v173_v4 = vadd.f32 %v157_v51, %v89_v54 }
  0x85   :  { %v147_v29 = vpop.permute.xlu1 %146  ;;  %v77_v30 = vpop.permute.xlu0 %76  ;;  %v174_v8 = vadd.f32 %v158_v52, %v90_v56  ;;  %v868_v12 = vadd.f32 %v165_v53, %v97_v57  ;;  %v870_v14 = vadd.f32 %v166_v55, %v98_v58 }
  0x86   :  { %v159_v62 = vmul.f32 %v147_v29, %v128_v33  ;;  %v91_v63 = vmul.f32 %v77_v30, %v56_v36  ;;  %v160_v15 = vmul.f32 %v147_v29, %v132_v34  ;;  %v167_v16 = vmul.f32 %v147_v29, %v136_v35 }
  0x87   :  { %v168_v17 = vmul.f32 %v147_v29, %v840_v37  ;;  %v92_v18 = vmul.f32 %v77_v30, %v60_v38  ;;  %v99_v19 = vmul.f32 %v77_v30, %v64_v39  ;;  %v100_v20 = vmul.f32 %v77_v30, %v68_v40 }
  0x88   :  { %v175_v21 = vadd.f32 %v159_v62, %v91_v63 }
  0x89   :  { %v151_v45 = vpop.permute.xlu1 %150  ;;  %v82_v46 = vpop.permute.xlu0 %81  ;;  %v176_v50 = vadd.f32 %v160_v15, %v92_v18  ;;  %v183_v30 = vadd.f32 %v167_v16, %v99_v19  ;;  %v184_v51 = vadd.f32 %v168_v17, %v100_v20 }
  0x8a   :  { %v161_v22 = vmul.f32 %v151_v45, %v128_v33  ;;  %v162_v23 = vmul.f32 %v151_v45, %v132_v34  ;;  %v169_v24 = vmul.f32 %v151_v45, %v136_v35  ;;  %v170_v25 = vmul.f32 %v151_v45, %v840_v37 }
  0x8b   :  { %v93_v26 = vmul.f32 %v82_v46, %v56_v36  ;;  %v94_v28 = vmul.f32 %v82_v46, %v60_v38  ;;  %v101_v41 = vmul.f32 %v82_v46, %v64_v39  ;;  %v102_v42 = vmul.f32 %v82_v46, %v68_v40 }
  0x8d   :  { %v155_v0 = vpop.permute.xlu1 %154  ;;  %v87_v1 = vpop.permute.xlu0 %86 }
  0x8e   :  { %v163_v43 = vmul.f32 %v155_v0, %v128_v33  ;;  %v164_v44 = vmul.f32 %v155_v0, %v132_v34  ;;  %v171_v47 = vmul.f32 %v155_v0, %v136_v35  ;;  %v95_v48 = vmul.f32 %v87_v1, %v56_v36 }
  0x8f   :  { %v96_v29 = vmul.f32 %v87_v1, %v60_v38  ;;  %v103_v49 = vmul.f32 %v87_v1, %v64_v39  ;;  %v172_v52 = vmul.f32 %v155_v0, %v840_v37  ;;  %v104_v53 = vmul.f32 %v87_v1, %v68_v40 }
  0x90   :  { %v177_v33 = vadd.f32 %v161_v22, %v93_v26  ;;  %v178_v34 = vadd.f32 %v162_v23, %v94_v28  ;;  %v185_v35 = vadd.f32 %v169_v24, %v101_v41  ;;  %v186_v38 = vadd.f32 %v170_v25, %v102_v42 }
  0x91   :  { %v179_v39 = vadd.f32 %v163_v43, %v95_v48  ;;  %v180_v57 = vadd.f32 %v164_v44, %v96_v29  ;;  %v187_v58 = vadd.f32 %v171_v47, %v103_v49  ;;  %v188_v0 = vadd.f32 %v172_v52, %v104_v53 }
  0x92   :  { %v231_v31 = vpop.permute.xlu1 %230  ;;  %v227_v32 = vpop.permute.xlu0 %226 }
  0x93   :  { %v243_v45 = vmul.f32 %v231_v31, %v849_v59  ;;  %v244_v54 = vmul.f32 %v231_v31, %v852_v60  ;;  %v241_v55 = vmul.f32 %v227_v32, %v849_v59  ;;  %v242_v36 = vmul.f32 %v227_v32, %v852_v60 }
  0x94   :  { %v251_v37 = vmul.f32 %v231_v31, %v855_v61  ;;  %v252_v40 = vmul.f32 %v231_v31, %v858_v2  ;;  %v249_v62 = vmul.f32 %v227_v32, %v855_v61  ;;  %v250_v63 = vmul.f32 %v227_v32, %v858_v2 }
  0x95   :  { %v259_v1 = vadd.f32 %v243_v45, %v175_v21  ;;  %v260_v15 = vadd.f32 %v244_v54, %v176_v50  ;;  %v257_v16 = vadd.f32 %v241_v55, %v173_v4  ;;  %v258_v17 = vadd.f32 %v242_v36, %v174_v8 }
  0x96   :  { %v235_v56 = vpop.permute.xlu1 %234  ;;  %v239_v46 = vpop.permute.xlu0 %238  ;;  %v267_v21 = vadd.f32 %v251_v37, %v183_v30  ;;  %v268_v31 = vadd.f32 %v252_v40, %v184_v51  ;;  %v265_v4 = vadd.f32 %v249_v62, %v868_v12  ;;  %v266_v8 = vadd.f32 %v250_v63, %v870_v14 }
  0x97   :  { %v245_v18 = vmul.f32 %v235_v56, %v849_v59  ;;  %v246_v19 = vmul.f32 %v235_v56, %v852_v60  ;;  %v253_v20 = vmul.f32 %v235_v56, %v855_v61  ;;  %v254_v24 = vmul.f32 %v235_v56, %v858_v2 }
  0x98   :  { %v247_v25 = vmul.f32 %v239_v46, %v849_v59  ;;  %v248_v47 = vmul.f32 %v239_v46, %v852_v60  ;;  %v255_v59 = vmul.f32 %v239_v46, %v855_v61  ;;  %v256_v48 = vmul.f32 %v239_v46, %v858_v2 }
  0x99   :  { %v261_v44 = vadd.f32 %v245_v18, %v177_v33  ;;  %v262_v49 = vadd.f32 %v246_v19, %v178_v34  ;;  %v269_v50 = vadd.f32 %v253_v20, %v185_v35  ;;  %v270_v30 = vadd.f32 %v254_v24, %v186_v38 }
  0x9a   :  { %v263_v12 = vadd.f32 %v247_v25, %v179_v39  ;;  %v264_v35 = vadd.f32 %v248_v47, %v180_v57  ;;  %v271_v36 = vadd.f32 %v255_v59, %v187_v58  ;;  %v272_v37 = vadd.f32 %v256_v48, %v188_v0 }
  0x9b   :  { %v311_v22 = vpop.permute.xlu1 %310  ;;  %v315_v23 = vpop.permute.xlu0 %314 }
  0x9c   :  { %v325_v26 = vmul.f32 %v311_v22, %v860_v3  ;;  %v326_v28 = vmul.f32 %v311_v22, %v862_v5  ;;  %v333_v32 = vmul.f32 %v311_v22, %v864_v6  ;;  %v334_v41 = vmul.f32 %v311_v22, %v866_v7 }
  0x9d   :  { %v327_v14 = vmul.f32 %v315_v23, %v860_v3  ;;  %v328_v52 = vmul.f32 %v315_v23, %v862_v5  ;;  %v335_v54 = vmul.f32 %v315_v23, %v864_v6  ;;  %v336_v60 = vmul.f32 %v315_v23, %v866_v7 }
  0x9e   :  { %v341_v42 = vadd.f32 %v325_v26, %v257_v16  ;;  %v342_v43 = vadd.f32 %v326_v28, %v258_v17  ;;  %v349_v55 = vadd.f32 %v333_v32, %v265_v4  ;;  %v350_v61 = vadd.f32 %v334_v41, %v266_v8 }
  0x9f   :  { %v319_v29 = vpop.permute.xlu1 %318  ;;  %v343_v62 = vadd.f32 %v327_v14, %v259_v1  ;;  %v344_v63 = vadd.f32 %v328_v52, %v260_v15  ;;  %v351_v20 = vadd.f32 %v335_v54, %v267_v21  ;;  %v352_v22 = vadd.f32 %v336_v60, %v268_v31 }
  0xa0   :  { %v359_v51 = vpop.permute.xlu0 %358  ;;  %v337_v2 = vmul.f32 %v319_v29, %v864_v6  ;;  %v338_v56 = vmul.f32 %v319_v29, %v866_v7  ;;  %v329_v16 = vmul.f32 %v319_v29, %v860_v3  ;;  %v330_v17 = vmul.f32 %v319_v29, %v862_v5 }
  0xa1   :  { %v373_v53 = vadd.f32 %v359_v51, %v341_v42  ;;  %v374_v45 = vadd.f32 %v359_v51, %v342_v43  ;;  %v381_v18 = vadd.f32 %v359_v51, %v349_v55  ;;  %v382_v19 = vadd.f32 %v359_v51, %v350_v61 }
  0xa2   :  { %v353_v23 = vadd.f32 %v337_v2, %v269_v50  ;;  %v354_v57 = vadd.f32 %v338_v56, %v270_v30  ;;  %v345_v32 = vadd.f32 %v329_v16, %v261_v44  ;;  %v346_v41 = vadd.f32 %v330_v17, %v262_v49 }
  0xa3   :  { %v323_v46 = vpop.permute.xlu1 %322  ;;  %v389_v33 = vmax.f32 %v373_v53, 0.0  ;;  %v390_v34 = vmax.f32 %v374_v45, 0.0  ;;  %v397_v4 = vmax.f32 %v381_v18, 0.0  ;;  %v398_v8 = vmax.f32 %v382_v19, 0.0 }
  0xa4   :  { %v339_v38 = vmul.f32 %v323_v46, %v864_v6  ;;  %v340_v39 = vmul.f32 %v323_v46, %v866_v7  ;;  %v331_v58 = vmul.f32 %v323_v46, %v860_v3  ;;  %v332_v6 = vmul.f32 %v323_v46, %v862_v5  ;;  %v371_v1 = vpop.permute.xlu0 %370 }
  0xa5   :  { %v405_v40 = vadd.f32 %v390_v34, %v389_v33  ;;  %v417_v49 = vadd.f32 %v398_v8, %v397_v4  ;;  %v780_v16 = vmov 0.0  }
  0xa6   :  { %v355_v0 = vadd.f32 %v339_v38, %v271_v36  ;;  %v356_v24 = vadd.f32 %v340_v39, %v272_v37  ;;  %v347_v5 = vadd.f32 %v331_v58, %v263_v12  ;;  %v348_v48 = vadd.f32 %v332_v6, %v264_v35  ;;  %v17_v36 = vld [vmem:[%s968_s1 + $0x20] sm:$0xff]  ;;  %v18_v38 = vld [vmem:[%s968_s1 + $0x28] sm:$0xff]  ;;  %715 = vmatprep.mubr.msk.f32.mxu0 %vm779_vm0, %v780_v16 }
  0xa7   :  { %406 = vadd.xlane.f32.xlu1 %v405_v40  ;;  %v738_v39 = vpack.c.bf16 %v18_v38, %v17_v36  ;;  %v778_v37 = vmov 0.0|0.0   ;;  %v19_v40 = vld [vmem:[%s968_s1 + $0x30] sm:$0xff]  ;;  %734 = vmatprep.mubr.msk.f32.mxu1 %vm779_vm0, %v780_v16 }
  0xa8   :  { %v363_v7 = vpop.permute.xlu1 %362  ;;  %v387_v3 = vadd.f32 %v371_v1, %v355_v0  ;;  %v388_v59 = vadd.f32 %v371_v1, %v356_v24  ;;  %v379_v54 = vadd.f32 %v371_v1, %v347_v5  ;;  %v380_v60 = vadd.f32 %v371_v1, %v348_v48  ;;  %737 = vmatprep.subr.bf16.mxu0 %v778_v37 }
  0xa9   :  { %v375_v15 = vadd.f32 %v363_v7, %v343_v62  ;;  %v376_v25 = vadd.f32 %v363_v7, %v344_v63  ;;  %v383_v26 = vadd.f32 %v363_v7, %v351_v20  ;;  %v384_v28 = vadd.f32 %v363_v7, %v352_v22  ;;  %743 = vmatprep.subr.bf16.mxu1 %v778_v37  ;;  %v20_v62 = vld [vmem:[%s968_s1 + $0x38] sm:$0xff] }
  0xaa   :  { %v403_v45 = vmax.f32 %v387_v3, 0.0  ;;  %v404_v56 = vmax.f32 %v388_v59, 0.0  ;;  %v395_v33 = vmax.f32 %v379_v54, 0.0  ;;  %v396_v34 = vmax.f32 %v380_v60, 0.0  ;;  %739 = vmatpush3.bf16.msra.mxu0 %v738_v39  ;;  %v24_v54 = vld [vmem:[%s968_s1 + $0x58] sm:$0xff]  ;;  %v25_v60 = vld [vmem:[%s968_s1 + $0x60] sm:$0xff] }
  0xab   :  { %v391_v21 = vmax.f32 %v375_v15, 0.0  ;;  %v392_v31 = vmax.f32 %v376_v25, 0.0  ;;  %v399_v42 = vmax.f32 %v383_v26, 0.0  ;;  %v400_v43 = vmax.f32 %v384_v28, 0.0  ;;  %740 = vmatprep.subr.bf16.mxu0 %v778_v37 }
  0xac   :  { %v367_v47 = vpop.permute.xlu1 %366  ;;  %v426_v46 = vadd.f32 %v404_v56, %v403_v45  ;;  %v414_v35 = vadd.f32 %v396_v34, %v395_v33  ;;  %v741_v63 = vpack.c.bf16 %v20_v62, %v19_v40  ;;  %v451_v20 = vand.u32 127, %v33_v9  ;;  %v21_v34 = vld [vmem:[%s968_s1 + $0x40] sm:$0x7] }
  0xad   :  { %v408_v29 = vadd.f32 %v392_v31, %v391_v21  ;;  %v420_v50 = vadd.f32 %v400_v43, %v399_v42  ;;  %v385_v30 = vadd.f32 %v367_v47, %v353_v23  ;;  %v386_v51 = vadd.f32 %v367_v47, %v354_v57 }
  0xae   :  { %v377_v14 = vadd.f32 %v367_v47, %v345_v32  ;;  %v378_v52 = vadd.f32 %v367_v47, %v346_v41  ;;  %742 = vmatpush3.bf16.msra.mxu0 %v741_v63  ;;  %v456_v22 = vadd.s32 4294967288, %v451_v20  ;;  %v463_v57 = vadd.s32 4294967280, %v451_v20 }
  0xaf   :  { %409 = vadd.xlane.f32.xlu0 %v408_v29  ;;  %421 = vadd.xlane.f32.xlu1 %v420_v50  ;;  %v401_v53 = vmax.f32 %v385_v30, 0.0  ;;  %v402_v44 = vmax.f32 %v386_v51, 0.0  ;;  %v470_v6 = vadd.s32 4294967272, %v451_v20  ;;  %v454_v0 = vsub.s32 %v451_v20, %v809_v10 }
  0xb0   :  { %v393_v61 = vmax.f32 %v377_v14, 0.0  ;;  %v394_v2 = vmax.f32 %v378_v52, 0.0  ;;  %v459_v24 = vsub.s32 %v456_v22, %v809_v10  ;;  %v466_v25 = vsub.s32 %v463_v57, %v809_v10 }
  0xb1   :  { %v423_v55 = vadd.f32 %v402_v44, %v401_v53  ;;  %v473_v4 = vsub.s32 %v470_v6, %v809_v10  ;;  %v22_v44 = vld [vmem:[%s968_s1 + $0x48] sm:$0xff] }
  0xb2   :  { %v411_v12 = vadd.f32 %v394_v2, %v393_v61  ;;  %v26_v61 = vld [vmem:[%s968_s1 + $0x68] sm:$0xff]  ;;  %v27_v2 = vld [vmem:[%s968_s1 + $0x70] sm:$0xff] }
  0xb3   :  { %418 = vadd.xlane.f32.xlu0 %v417_v49  ;;  %424 = vadd.xlane.f32.xlu1 %v423_v55  ;;  %v23_v49 = vld [vmem:[%s968_s1 + $0x50] sm:$0xff]  ;;  %v747_v55 = vpack.c.bf16 %v25_v60, %v24_v54  ;;  %v750_v56 = vpack.c.bf16 %v27_v2, %v26_v61 }
  0xb4   :  { %v744_v45 = vpack.c.bf16 %v23_v49, %v22_v44 }
  0xb6   :  { %745 = vmatpush3.bf16.msra.mxu1 %v744_v45 }
  0xb7   :  { %412 = vadd.xlane.f32.xlu0 %v411_v12  ;;  %427 = vadd.xlane.f32.xlu1 %v426_v46  ;;  %v28_v12 = vld [vmem:[%s968_s1 + $0x78] sm:$0xff]  ;;  %v29_v46 = vld [vmem:[%s968_s1 + $0x80] sm:$0xff] }
  0xb8   :  { %746 = vmatprep.subr.bf16.mxu1 %v778_v37  ;;  %v753_v33 = vpack.c.bf16 %v29_v46, %v28_v12 }
  0xba   :  { %748 = vmatpush3.bf16.msra.mxu1 %v747_v55 }
  0xbb   :  { %415 = vadd.xlane.f32.xlu0 %v414_v35  ;;  %749 = vmatprep.subr.bf16.mxu1 %v778_v37  ;;  %v441_v35 = vrot.slane %v21_v34, %v816_v13 }
  0xbe   :  { %751 = vmatpush3.bf16.msra.mxu1 %v750_v56 }
  0xbf   :  { %752 = vmatprep.subr.bf16.mxu1 %v778_v37 }
  0xc2   :  { %754 = vmatpush3.bf16.msra.mxu1 %v753_v33 }
 0x134   :  { %v407_v17 = vpop.xlane.xlu1 %406 }
 0x135   :  { %v430_v9 = vmul.f32 0.00390625, %v407_v17 }
 0x137   :  { %v455_v59 = vrot.slane %v430_v9, %v454_v0 }
 0x13c   :  { %v410_v18 = vpop.xlane.xlu0 %409  ;;  %v422_v19 = vpop.xlane.xlu1 %421 }
 0x13d   :  { %v431_v1 = vmul.f32 0.00390625, %v410_v18  ;;  %v435_v15 = vmul.f32 0.00390625, %v422_v19 }
 0x13f   :  { %v460_v31 = vrot.slane %v431_v1, %v459_v24  ;;  %v484_v42 = vrot.slane %v435_v15, %v459_v24  ;;  %v597_v15 = vrot.slane %v21_v34, %v812_v11 }
 0x140   :  { %v419_v23 = vpop.xlane.xlu0 %418  ;;  %v425_v58 = vpop.xlane.xlu1 %424 }
 0x141   :  { %v434_v7 = vmul.f32 0.00390625, %v419_v23  ;;  %v436_v26 = vmul.f32 0.00390625, %v425_v58  ;;  %v462_v50 = vsel %vm461_vm1, %v460_v31, %v455_v59 }
 0x143   :  { %v480_v32 = vrot.slane %v434_v7, %v454_v0  ;;  %v489_v43 = vrot.slane %v436_v26, %v466_v25 }
 0x144   :  { %v413_v28 = vpop.xlane.xlu0 %412  ;;  %v428_v8 = vpop.xlane.xlu1 %427 }
 0x145   :  { %v432_v41 = vmul.f32 0.00390625, %v413_v28  ;;  %v437_v21 = vmul.f32 0.00390625, %v428_v8  ;;  %v485_v5 = vsel %vm461_vm1, %v484_v42, %v480_v32  ;;  %v602_v28 = vrot.slane %v21_v34, %v830_v27 }
 0x146   :  { %v490_v10 = vsel %vm468_vm2, %v489_v43, %v485_v5 }
 0x147   :  { %v467_v47 = vrot.slane %v432_v41, %v466_v25  ;;  %v494_v48 = vrot.slane %v437_v21, %v473_v4  ;;  %v691_v41 = vld [vmem:[%s968_s1 + $0x88] ss:$0 sm:$0xff] }
 0x148   :  { %v416_v3 = vpop.xlane.xlu0 %415 }
 0x149   :  { %v433_v29 = vmul.f32 0.00390625, %v416_v3  ;;  %v469_v51 = vsel %vm468_vm2, %v467_v47, %v462_v50  ;;  %v495_v52 = vsel %vm475_vm3, %v494_v48, %v490_v10 }
 0x14b   :  { %v474_v30 = vrot.slane %v433_v29, %v473_v4 }
 0x14d   :  { %v476_v14 = vsel %vm475_vm3, %v474_v30, %v469_v51 }
 0x14e   :  { %v497_v53 = vsel %vm496_vm4, %v495_v52, %v476_v14 }
 0x14f   :  { %716 = vmatmul.mubr.msk.f32.vlgmr.msra.gmra.mrb[0].mxu0 %vm498_vm5, %v497_v53 }
 0x222   :  { %v567_v36 = vpop.f32.mrb[0].mxu0 }
 0x223   :  { %v568_v38 = vadd.f32 %v567_v36, %v441_v35  ;;  %v717_v39 = vpop.f32.mrb[1].mxu0 }
 0x225   :  { %v572_v40 = vsel %vm571_vm6, %v568_v38, 0.0 }
 0x226   :  { %v573_v62 = vrot.slane %v572_v40, 4 }
 0x228   :  { %v574_v63 = vadd.f32 %v573_v62, %v572_v40 }
 0x22a   :  { %v575_v16 = vrot.slane %v574_v63, 2 }
 0x22c   :  { %v576_v17 = vadd.f32 %v575_v16, %v574_v63 }
 0x22e   :  { %v577_v18 = vrot.slane %v576_v17, 1 }
 0x230   :  { %v578_v19 = vadd.f32 %v577_v18, %v576_v17 }
 0x232   :  { %v580_v20 = vmul.f32 0.5, %v578_v19 }
 0x234   :  { %v581_v37 = vsub.f32 %v568_v38, %v580_v20 }
 0x236   :  { %v582_v22 = vmul.f32 %v581_v37, %v581_v37 }
 0x238   :  { %v583_v23 = vsel %vm571_vm6, %v582_v22, 0.0 }
 0x239   :  { %v584_v57 = vrot.slane %v583_v23, 4 }
 0x23b   :  { %v585_v58 = vadd.f32 %v584_v57, %v583_v23 }
 0x23d   :  { %v586_v6 = vrot.slane %v585_v58, 2 }
 0x23f   :  { %v587_v7 = vadd.f32 %v586_v6, %v585_v58 }
 0x241   :  { %v588_v13 = vrot.slane %v587_v7, 1 }
 0x243   :  { %v589_v0 = vadd.f32 %v588_v13, %v587_v7 }
 0x245   :  { %v590_v24 = vmul.f32 0.5, %v589_v0 }
 0x247   :  { %v591_v1 = vadd.f32 1e-05, %v590_v24 }
 0x249   :  { %771 = vrsqrt.f32 %v591_v1 }
 0x253   :  { %v772_v25 = vpop.eup %771 }
 0x254   :  { %v593_v26 = vmul.f32 %v772_v25, %v581_v37 }
 0x256   :  { %v598_v4 = vmul.f32 %v597_v15, %v593_v26 }
 0x258   :  { %v603_v8 = vadd.f32 %v602_v28, %v598_v4 }
 0x25a   :  { %v604_v9 = vmax.f32 %v603_v8, 0.0 }
 0x25c   :  { %v606_v32 = vsel %vm605_vm7, %v604_v9, 0.0 }
 0x25d   :  { %735 = vmatmul.mubr.msk.f32.vlgmr.msra.gmra.mrb[0].mxu1 %vm611_vm8, %v606_v32 }
 0x330   :  { %v681_v21 = vpop.f32.mrb[0].mxu1 }
 0x331   :  { %v682_v31 = vadd.f32 %v691_v41, %v681_v21  ;;  %v736_v42 = vpop.f32.mrb[1].mxu1 }
 0x333   :  { %685 = vst [vmem:[%s970_s2] sm:$0xff] %v682_v31 }

</bundles_post_ra>
